<compile_context>
chip_gen: v7x
topology: tpu7x:2x2x1
jax: 0.10.0
libtpu: 0.0.40
codegen_flags: <defaults>
</compile_context>

<pallas_src>
import math
import functools

import jax
import jax.numpy as jnp
from jax.experimental import pallas as pl
from jax.experimental.pallas import tpu as pltpu

MODEL_DIM = 32
NUM_HEADS = 4
HEAD_DIM = MODEL_DIM // NUM_HEADS
LN_EPS = 1e-5
NEG_INF = -1e30


def _layernorm(x, gamma, beta):
    mu = jnp.mean(x, axis=-1, keepdims=True)
    var = jnp.mean((x - mu) ** 2, axis=-1, keepdims=True)
    return (x - mu) * jax.lax.rsqrt(var + LN_EPS) * gamma + beta


def transformer_block_kernel(x_ref, mask_ref,
                             ln1g_ref, ln1b_ref,
                             wqkv_ref, bqkv_ref,      # (D, 3D) bf16 (Q cols pre-scaled), (1, 3D) f32
                             wout_ref, bout_ref,      # (D, D) bf16, (1, D) f32
                             ln2g_ref, ln2b_ref,
                             w1_ref, b1_ref,          # (D, 4D) bf16, (1, 4D) f32
                             w2_ref, b2_ref,          # (4D, D) bf16, (1, D) f32
                             out_ref,
                             *, batch, seq_len, num_heads, head_dim):
    B, T, H, Hd = batch, seq_len, num_heads, head_dim
    x = x_ref[...]                                    # (N, D) f32, N = B*T
    N, D = x.shape

    # ---- LN1 + single wide QKV projection ---------------------------------
    h1 = _layernorm(x, ln1g_ref[...], ln1b_ref[...]).astype(jnp.bfloat16)
    qkv = jnp.dot(h1, wqkv_ref[...],
                  preferred_element_type=jnp.float32) + bqkv_ref[...]      # (N, 3D) f32
    qkv3 = qkv.reshape(B, T, 3 * D).astype(jnp.bfloat16)                   # (B, T, 3D) bf16

    mask = mask_ref[...]                              # (T, T) additive causal bias, f32

    # ---- per-head causal attention (heads are static lane-slice views) ----
    ctx_parts = []
    for h in range(H):                                # H = 4, unrolled at trace time
        off = h * Hd
        qh = qkv3[:, :, off:off + Hd]                 # (B, T, Hd) bf16, 1/sqrt(Hd) folded in
        kh = qkv3[:, :, D + off:D + off + Hd]
        vh = qkv3[:, :, 2 * D + off:2 * D + off + Hd]

        s = jnp.einsum('bqd,bkd->bqk', qh, kh,
                       preferred_element_type=jnp.float32)                 # (B, T, T) f32
        s = s + mask
        s = s - jnp.max(s, axis=-1, keepdims=True)
        p = jnp.exp(s)
        p = p * pl.reciprocal(jnp.sum(p, axis=-1, keepdims=True), approx=True)
        ctx_parts.append(jnp.einsum('bqk,bkd->bqd', p.astype(jnp.bfloat16), vh,
                                    preferred_element_type=jnp.float32))   # (B, T, Hd) f32

    # ---- fused output projection: pack heads along lanes, one K=32 matmul -
    ctx = jnp.concatenate(ctx_parts, axis=-1)         # (B, T, D), lane order h*Hd + d
    ctx = ctx.reshape(N, D).astype(jnp.bfloat16)
    attn = jnp.dot(ctx, wout_ref[...],
                   preferred_element_type=jnp.float32) + bout_ref[...]     # (N, D) f32

    x1 = x + attn                                     # residual (dropout == identity)

    # ---- LN2 + GELU MLP ----------------------------------------------------
    h2 = _layernorm(x1, ln2g_ref[...], ln2b_ref[...]).astype(jnp.bfloat16)
    f = jnp.dot(h2, w1_ref[...], preferred_element_type=jnp.float32) + b1_ref[...]
    f = jax.nn.gelu(f, approximate=True)              # tanh GELU -> EUP slot, f32
    f = jnp.dot(f.astype(jnp.bfloat16), w2_ref[...],
                preferred_element_type=jnp.float32) + b2_ref[...]

    out_ref[...] = (x1 + f).astype(out_ref.dtype)     # residual (dropout == identity)


def transformer_block(x, params):
    B, T, D = x.shape
    H, Hd = NUM_HEADS, HEAD_DIM
    (ln1_g, ln1_b, wqkv, bqkv, wout, bout, ln2_g, ln2_b, w1, b1, w2, b2) = params

    # --- wrapper-side prep: fold 1/sqrt(Hd) into the Q columns, bf16 weight casts
    scale = 1.0 / math.sqrt(Hd)
    col_scale = jnp.concatenate([jnp.full((D,), scale, jnp.float32),
                                 jnp.ones((2 * D,), jnp.float32)])
    wqkv_s = (wqkv * col_scale[None, :]).astype(jnp.bfloat16)     # (D, 3D)
    bqkv_s = (bqkv * col_scale[None, :]).astype(jnp.float32)      # (1, 3D)
    wout_b = wout.astype(jnp.bfloat16)
    w1_b = w1.astype(jnp.bfloat16)
    w2_b = w2.astype(jnp.bfloat16)

    # --- causal additive mask, hoisted out of the kernel body
    row = jax.lax.broadcasted_iota(jnp.int32, (T, T), 0)
    col = jax.lax.broadcasted_iota(jnp.int32, (T, T), 1)
    mask_bias = jnp.where(col <= row, 0.0, NEG_INF).astype(jnp.float32)

    x2d = x.reshape(B * T, D)                         # all row-parallel matmuls see M = B*T

    def full(shape):
        return pl.BlockSpec(shape, lambda i: (0,) * len(shape))

    in_specs = [
        full((B * T, D)),                             # x
        full((T, T)),                                 # causal mask bias
        full((1, D)), full((1, D)),                   # ln1 gamma/beta
        full((D, 3 * D)), full((1, 3 * D)),           # Wqkv, bqkv
        full((D, D)), full((1, D)),                   # Wout, bout
        full((1, D)), full((1, D)),                   # ln2 gamma/beta
        full((D, 4 * D)), full((1, 4 * D)),           # W1, b1
        full((4 * D, D)), full((1, D)),               # W2, b2
    ]
    out_spec = full((B * T, D))

    kern = functools.partial(transformer_block_kernel,
                             batch=B, seq_len=T, num_heads=H, head_dim=Hd)

    out2d = pl.pallas_call(
        kern,
        out_shape=jax.ShapeDtypeStruct((B * T, D), x.dtype),
        grid_spec=pl.GridSpec(grid=(1,), in_specs=in_specs, out_specs=out_spec),
        compiler_params=pltpu.CompilerParams(dimension_semantics=("arbitrary",)),
    )(x2d, mask_bias,
      ln1_g, ln1_b, wqkv_s, bqkv_s, wout_b, bout,
      ln2_g, ln2_b, w1_b, b1, w2_b, b2)

    return out2d.reshape(B, T, D)


def init_params(key, D=MODEL_DIM):
    ks = jax.random.split(key, 6)
    scale = 0.02
    ln1_g = jnp.ones((1, D), jnp.float32)
    ln1_b = jnp.zeros((1, D), jnp.float32)
    wqkv = scale * jax.random.normal(ks[0], (D, 3 * D), jnp.float32)
    bqkv = scale * jax.random.normal(ks[1], (1, 3 * D), jnp.float32)
    wout = scale * jax.random.normal(ks[2], (D, D), jnp.float32)
    bout = jnp.zeros((1, D), jnp.float32)
    ln2_g = jnp.ones((1, D), jnp.float32)
    ln2_b = jnp.zeros((1, D), jnp.float32)
    w1 = scale * jax.random.normal(ks[3], (D, 4 * D), jnp.float32)
    b1 = scale * jax.random.normal(ks[4], (1, 4 * D), jnp.float32)
    w2 = scale * jax.random.normal(ks[5], (4 * D, D), jnp.float32)
    b2 = jnp.zeros((1, D), jnp.float32)
    return (ln1_g, ln1_b, wqkv, bqkv, wout, bout, ln2_g, ln2_b, w1, b1, w2, b2)


def reference_block(x, params):
    """Pure-JAX f32 reference mirroring the PyTorch forward (dropout=identity)."""
    (ln1_g, ln1_b, wqkv, bqkv, wout, bout, ln2_g, ln2_b, w1, b1, w2, b2) = params
    B, T, D = x.shape

    def ln(z, g, b):
        mu = jnp.mean(z, axis=-1, keepdims=True)
        var = jnp.mean((z - mu) ** 2, axis=-1, keepdims=True)
        return (z - mu) / jnp.sqrt(var + LN_EPS) * g + b

    h = ln(x, ln1_g[0], ln1_b[0])
    qkv = h @ wqkv + bqkv[0]
    q, k, v = jnp.split(qkv, 3, axis=-1)
    reshape_heads = lambda t: t.reshape(B, T, NUM_HEADS, HEAD_DIM).transpose(0, 2, 1, 3)
    q, k, v = map(reshape_heads, (q, k, v))
    s = jnp.einsum("bhqd,bhkd->bhqk", q, k) / math.sqrt(HEAD_DIM)
    mask = jnp.tril(jnp.ones((T, T), bool))
    s = jnp.where(mask, s, -jnp.inf)
    p = jax.nn.softmax(s, axis=-1)
    o = jnp.einsum("bhqk,bhkd->bhqd", p, v).transpose(0, 2, 1, 3).reshape(B, T, D)
    x1 = x + (o @ wout + bout[0])
    h2 = ln(x1, ln2_g[0], ln2_b[0])
    f = jax.nn.gelu(h2 @ w1 + b1[0], approximate=False) @ w2 + b2[0]
    return x1 + f


if __name__ == "__main__":
    key = jax.random.PRNGKey(0)
    kx, kp = jax.random.split(key)
    B, T, D = 2, 8, MODEL_DIM
    x = jax.random.normal(kx, (B, T, D), jnp.float32)
    params = init_params(kp, D)

    out = transformer_block(x, params)
    out = jax.block_until_ready(out)

    ref = reference_block(x, params)
    # bf16 matmul inputs (f32 accumulation) + tanh GELU -> relaxed tolerance vs f32/erf ref.
    assert jnp.allclose(out, ref, atol=2e-2, rtol=2e-2), "mismatch vs reference"
    print("KERNEL_OK")
</pallas_src>

<mosaic_0001>
module attributes {stable_mosaic.version = 11 : i64} {
  func.func @transformer_block_kernel(%arg0: i32, %arg1: memref<16x32xf32, #tpu.memory_space<vmem>>, %arg2: memref<8x8xf32, #tpu.memory_space<vmem>>, %arg3: memref<1x32xf32, #tpu.memory_space<vmem>>, %arg4: memref<1x32xf32, #tpu.memory_space<vmem>>, %arg5: memref<32x96xbf16, #tpu.memory_space<vmem>>, %arg6: memref<1x96xf32, #tpu.memory_space<vmem>>, %arg7: memref<32x32xbf16, #tpu.memory_space<vmem>>, %arg8: memref<1x32xf32, #tpu.memory_space<vmem>>, %arg9: memref<1x32xf32, #tpu.memory_space<vmem>>, %arg10: memref<1x32xf32, #tpu.memory_space<vmem>>, %arg11: memref<32x128xbf16, #tpu.memory_space<vmem>>, %arg12: memref<1x128xf32, #tpu.memory_space<vmem>>, %arg13: memref<128x32xbf16, #tpu.memory_space<vmem>>, %arg14: memref<1x32xf32, #tpu.memory_space<vmem>>, %arg15: memref<16x32xf32, #tpu.memory_space<vmem>>) attributes {dimension_semantics = [#tpu.dimension_semantics<arbitrary>], iteration_bounds = array<i64: 1>, scalar_prefetch = 0 : i64, scratch_operands = 0 : i64, tpu.core_type = #tpu.core_type<tc>, window_params = [{pipeline_mode = #tpu.pipeline_mode<synchronous>, transform_indices = @transform_0, window_bounds = array<i64: 16, 32>}, {pipeline_mode = #tpu.pipeline_mode<synchronous>, transform_indices = @transform_1, window_bounds = array<i64: 8, 8>}, {pipeline_mode = #tpu.pipeline_mode<synchronous>, transform_indices = @transform_2, window_bounds = array<i64: 1, 32>}, {pipeline_mode = #tpu.pipeline_mode<synchronous>, transform_indices = @transform_3, window_bounds = array<i64: 1, 32>}, {pipeline_mode = #tpu.pipeline_mode<synchronous>, transform_indices = @transform_4, window_bounds = array<i64: 32, 96>}, {pipeline_mode = #tpu.pipeline_mode<synchronous>, transform_indices = @transform_5, window_bounds = array<i64: 1, 96>}, {pipeline_mode = #tpu.pipeline_mode<synchronous>, transform_indices = @transform_6, window_bounds = array<i64: 32, 32>}, {pipeline_mode = #tpu.pipeline_mode<synchronous>, transform_indices = @transform_7, window_bounds = array<i64: 1, 32>}, {pipeline_mode = #tpu.pipeline_mode<synchronous>, transform_indices = @transform_8, window_bounds = array<i64: 1, 32>}, {pipeline_mode = #tpu.pipeline_mode<synchronous>, transform_indices = @transform_9, window_bounds = array<i64: 1, 32>}, {pipeline_mode = #tpu.pipeline_mode<synchronous>, transform_indices = @transform_10, window_bounds = array<i64: 32, 128>}, {pipeline_mode = #tpu.pipeline_mode<synchronous>, transform_indices = @transform_11, window_bounds = array<i64: 1, 128>}, {pipeline_mode = #tpu.pipeline_mode<synchronous>, transform_indices = @transform_12, window_bounds = array<i64: 128, 32>}, {pipeline_mode = #tpu.pipeline_mode<synchronous>, transform_indices = @transform_13, window_bounds = array<i64: 1, 32>}, {pipeline_mode = #tpu.pipeline_mode<synchronous>, transform_indices = @transform_14, window_bounds = array<i64: 16, 32>}]} {
    %c0 = arith.constant 0 : index
    %c0_0 = arith.constant 0 : index
    %0 = vector.load %arg1[%c0, %c0_0] : memref<16x32xf32, #tpu.memory_space<vmem>>, vector<16x32xf32>
    %c0_1 = arith.constant 0 : index
    %c0_2 = arith.constant 0 : index
    %1 = vector.load %arg3[%c0_1, %c0_2] : memref<1x32xf32, #tpu.memory_space<vmem>>, vector<1x32xf32>
    %c0_3 = arith.constant 0 : index
    %c0_4 = arith.constant 0 : index
    %2 = vector.load %arg4[%c0_3, %c0_4] : memref<1x32xf32, #tpu.memory_space<vmem>>, vector<1x32xf32>
    %cst = arith.constant dense<0.000000e+00> : vector<16xf32>
    %3 = vector.multi_reduction <add>, %0, %cst [1] : vector<16x32xf32> to vector<16xf32>
    %4 = vector.shape_cast %3 : vector<16xf32> to vector<16x1xf32>
    %cst_5 = arith.constant 3.200000e+01 : f32
    %5 = vector.broadcast %cst_5 : f32 to vector<16x1xf32>
    %6 = arith.divf %4, %5 : vector<16x1xf32>
    %7 = vector.broadcast %6 : vector<16x1xf32> to vector<16x32xf32>
    %8 = arith.subf %0, %7 : vector<16x32xf32>
    %9 = arith.mulf %8, %8 : vector<16x32xf32>
    %cst_6 = arith.constant dense<0.000000e+00> : vector<16xf32>
    %10 = vector.multi_reduction <add>, %9, %cst_6 [1] : vector<16x32xf32> to vector<16xf32>
    %11 = vector.shape_cast %10 : vector<16xf32> to vector<16x1xf32>
    %cst_7 = arith.constant 3.200000e+01 : f32
    %12 = vector.broadcast %cst_7 : f32 to vector<16x1xf32>
    %13 = arith.divf %11, %12 : vector<16x1xf32>
    %14 = vector.broadcast %6 : vector<16x1xf32> to vector<16x32xf32>
    %15 = arith.subf %0, %14 : vector<16x32xf32>
    %cst_8 = arith.constant 9.99999974E-6 : f32
    %16 = vector.broadcast %cst_8 : f32 to vector<16x1xf32>
    %17 = arith.addf %13, %16 : vector<16x1xf32>
    %18 = math.rsqrt %17 : vector<16x1xf32>
    %19 = vector.broadcast %18 : vector<16x1xf32> to vector<16x32xf32>
    %20 = arith.mulf %15, %19 : vector<16x32xf32>
    %21 = vector.broadcast %1 : vector<1x32xf32> to vector<16x32xf32>
    %22 = arith.mulf %20, %21 : vector<16x32xf32>
    %23 = vector.broadcast %2 : vector<1x32xf32> to vector<16x32xf32>
    %24 = arith.addf %22, %23 : vector<16x32xf32>
    %25 = arith.truncf %24 : vector<16x32xf32> to vector<16x32xbf16>
    %c0_9 = arith.constant 0 : index
    %c0_10 = arith.constant 0 : index
    %26 = vector.load %arg5[%c0_9, %c0_10] : memref<32x96xbf16, #tpu.memory_space<vmem>>, vector<32x96xbf16>
    %cst_11 = arith.constant dense<0.000000e+00> : vector<16x96xf32>
    %27 = tpu.matmul %25, %26, %cst_11 {dimension_numbers = #tpu.dot_dimension_numbers<[1], [0], [0], [1], [0, 0, 1, 1], [], []>} : vector<16x32xbf16>, vector<32x96xbf16>, vector<16x96xf32> -> vector<16x96xf32>
    %c0_12 = arith.constant 0 : index
    %c0_13 = arith.constant 0 : index
    %28 = vector.load %arg6[%c0_12, %c0_13] : memref<1x96xf32, #tpu.memory_space<vmem>>, vector<1x96xf32>
    %29 = vector.broadcast %28 : vector<1x96xf32> to vector<16x96xf32>
    %30 = arith.addf %27, %29 : vector<16x96xf32>
    %31 = vector.shape_cast %30 : vector<16x96xf32> to vector<2x8x96xf32>
    %32 = arith.truncf %31 : vector<2x8x96xf32> to vector<2x8x96xbf16>
    %c0_14 = arith.constant 0 : index
    %c0_15 = arith.constant 0 : index
    %33 = vector.load %arg2[%c0_14, %c0_15] : memref<8x8xf32, #tpu.memory_space<vmem>>, vector<8x8xf32>
    %34 = vector.extract_strided_slice %32 {offsets = [0, 0, 0], sizes = [2, 8, 8], strides = [1, 1, 1]} : vector<2x8x96xbf16> to vector<2x8x8xbf16>
    %35 = vector.extract_strided_slice %32 {offsets = [0, 0, 32], sizes = [2, 8, 8], strides = [1, 1, 1]} : vector<2x8x96xbf16> to vector<2x8x8xbf16>
    %36 = vector.extract_strided_slice %32 {offsets = [0, 0, 64], sizes = [2, 8, 8], strides = [1, 1, 1]} : vector<2x8x96xbf16> to vector<2x8x8xbf16>
    "tpu.trace_start"() <{level = 10 : i32, message = "bqd,bkd->bqk"}> : () -> ()
    %cst_16 = arith.constant dense<0.000000e+00> : vector<2x8x8xf32>
    %37 = tpu.matmul %34, %35, %cst_16 {dimension_numbers = #tpu.dot_dimension_numbers<[2], [2], [1], [1], [0, 0, 0, 1, 1, 1], [0], [0]>} : vector<2x8x8xbf16>, vector<2x8x8xbf16>, vector<2x8x8xf32> -> vector<2x8x8xf32>
    "tpu.trace_stop"() : () -> ()
    %38 = vector.shape_cast %33 : vector<8x8xf32> to vector<1x8x8xf32>
    %39 = vector.broadcast %38 : vector<1x8x8xf32> to vector<2x8x8xf32>
    %40 = arith.addf %37, %39 : vector<2x8x8xf32>
    %cst_17 = arith.constant dense<0xFF800000> : vector<2x8xf32>
    %41 = vector.multi_reduction <maximumf>, %40, %cst_17 [2] : vector<2x8x8xf32> to vector<2x8xf32>
    %42 = vector.shape_cast %41 : vector<2x8xf32> to vector<2x8x1xf32>
    %43 = vector.broadcast %42 : vector<2x8x1xf32> to vector<2x8x8xf32>
    %44 = arith.subf %40, %43 : vector<2x8x8xf32>
    %45 = math.exp %44 : vector<2x8x8xf32>
    %cst_18 = arith.constant dense<0.000000e+00> : vector<2x8xf32>
    %46 = vector.multi_reduction <add>, %45, %cst_18 [2] : vector<2x8x8xf32> to vector<2x8xf32>
    %47 = vector.shape_cast %46 : vector<2x8xf32> to vector<2x8x1xf32>
    %48 = tpu.reciprocal %47 {approx = true} : vector<2x8x1xf32> -> vector<2x8x1xf32>
    %49 = vector.broadcast %48 : vector<2x8x1xf32> to vector<2x8x8xf32>
    %50 = arith.mulf %45, %49 : vector<2x8x8xf32>
    %51 = arith.truncf %50 : vector<2x8x8xf32> to vector<2x8x8xbf16>
    "tpu.trace_start"() <{level = 10 : i32, message = "bqk,bkd->bqd"}> : () -> ()
    %cst_19 = arith.constant dense<0.000000e+00> : vector<2x8x8xf32>
    %52 = tpu.matmul %51, %36, %cst_19 {dimension_numbers = #tpu.dot_dimension_numbers<[2], [1], [1], [2], [0, 0, 0, 1, 1, 2], [0], [0]>} : vector<2x8x8xbf16>, vector<2x8x8xbf16>, vector<2x8x8xf32> -> vector<2x8x8xf32>
    "tpu.trace_stop"() : () -> ()
    %53 = vector.extract_strided_slice %32 {offsets = [0, 0, 8], sizes = [2, 8, 8], strides = [1, 1, 1]} : vector<2x8x96xbf16> to vector<2x8x8xbf16>
    %54 = vector.extract_strided_slice %32 {offsets = [0, 0, 40], sizes = [2, 8, 8], strides = [1, 1, 1]} : vector<2x8x96xbf16> to vector<2x8x8xbf16>
    %55 = vector.extract_strided_slice %32 {offsets = [0, 0, 72], sizes = [2, 8, 8], strides = [1, 1, 1]} : vector<2x8x96xbf16> to vector<2x8x8xbf16>
    "tpu.trace_start"() <{level = 10 : i32, message = "bqd,bkd->bqk"}> : () -> ()
    %cst_20 = arith.constant dense<0.000000e+00> : vector<2x8x8xf32>
    %56 = tpu.matmul %53, %54, %cst_20 {dimension_numbers = #tpu.dot_dimension_numbers<[2], [2], [1], [1], [0, 0, 0, 1, 1, 1], [0], [0]>} : vector<2x8x8xbf16>, vector<2x8x8xbf16>, vector<2x8x8xf32> -> vector<2x8x8xf32>
    "tpu.trace_stop"() : () -> ()
    %57 = vector.shape_cast %33 : vector<8x8xf32> to vector<1x8x8xf32>
    %58 = vector.broadcast %57 : vector<1x8x8xf32> to vector<2x8x8xf32>
    %59 = arith.addf %56, %58 : vector<2x8x8xf32>
    %cst_21 = arith.constant dense<0xFF800000> : vector<2x8xf32>
    %60 = vector.multi_reduction <maximumf>, %59, %cst_21 [2] : vector<2x8x8xf32> to vector<2x8xf32>
    %61 = vector.shape_cast %60 : vector<2x8xf32> to vector<2x8x1xf32>
    %62 = vector.broadcast %61 : vector<2x8x1xf32> to vector<2x8x8xf32>
    %63 = arith.subf %59, %62 : vector<2x8x8xf32>
    %64 = math.exp %63 : vector<2x8x8xf32>
    %cst_22 = arith.constant dense<0.000000e+00> : vector<2x8xf32>
    %65 = vector.multi_reduction <add>, %64, %cst_22 [2] : vector<2x8x8xf32> to vector<2x8xf32>
    %66 = vector.shape_cast %65 : vector<2x8xf32> to vector<2x8x1xf32>
    %67 = tpu.reciprocal %66 {approx = true} : vector<2x8x1xf32> -> vector<2x8x1xf32>
    %68 = vector.broadcast %67 : vector<2x8x1xf32> to vector<2x8x8xf32>
    %69 = arith.mulf %64, %68 : vector<2x8x8xf32>
    %70 = arith.truncf %69 : vector<2x8x8xf32> to vector<2x8x8xbf16>
    "tpu.trace_start"() <{level = 10 : i32, message = "bqk,bkd->bqd"}> : () -> ()
    %cst_23 = arith.constant dense<0.000000e+00> : vector<2x8x8xf32>
    %71 = tpu.matmul %70, %55, %cst_23 {dimension_numbers = #tpu.dot_dimension_numbers<[2], [1], [1], [2], [0, 0, 0, 1, 1, 2], [0], [0]>} : vector<2x8x8xbf16>, vector<2x8x8xbf16>, vector<2x8x8xf32> -> vector<2x8x8xf32>
    "tpu.trace_stop"() : () -> ()
    %72 = vector.extract_strided_slice %32 {offsets = [0, 0, 16], sizes = [2, 8, 8], strides = [1, 1, 1]} : vector<2x8x96xbf16> to vector<2x8x8xbf16>
    %73 = vector.extract_strided_slice %32 {offsets = [0, 0, 48], sizes = [2, 8, 8], strides = [1, 1, 1]} : vector<2x8x96xbf16> to vector<2x8x8xbf16>
    %74 = vector.extract_strided_slice %32 {offsets = [0, 0, 80], sizes = [2, 8, 8], strides = [1, 1, 1]} : vector<2x8x96xbf16> to vector<2x8x8xbf16>
    "tpu.trace_start"() <{level = 10 : i32, message = "bqd,bkd->bqk"}> : () -> ()
    %cst_24 = arith.constant dense<0.000000e+00> : vector<2x8x8xf32>
    %75 = tpu.matmul %72, %73, %cst_24 {dimension_numbers = #tpu.dot_dimension_numbers<[2], [2], [1], [1], [0, 0, 0, 1, 1, 1], [0], [0]>} : vector<2x8x8xbf16>, vector<2x8x8xbf16>, vector<2x8x8xf32> -> vector<2x8x8xf32>
    "tpu.trace_stop"() : () -> ()
    %76 = vector.shape_cast %33 : vector<8x8xf32> to vector<1x8x8xf32>
    %77 = vector.broadcast %76 : vector<1x8x8xf32> to vector<2x8x8xf32>
    %78 = arith.addf %75, %77 : vector<2x8x8xf32>
    %cst_25 = arith.constant dense<0xFF800000> : vector<2x8xf32>
    %79 = vector.multi_reduction <maximumf>, %78, %cst_25 [2] : vector<2x8x8xf32> to vector<2x8xf32>
    %80 = vector.shape_cast %79 : vector<2x8xf32> to vector<2x8x1xf32>
    %81 = vector.broadcast %80 : vector<2x8x1xf32> to vector<2x8x8xf32>
    %82 = arith.subf %78, %81 : vector<2x8x8xf32>
    %83 = math.exp %82 : vector<2x8x8xf32>
    %cst_26 = arith.constant dense<0.000000e+00> : vector<2x8xf32>
    %84 = vector.multi_reduction <add>, %83, %cst_26 [2] : vector<2x8x8xf32> to vector<2x8xf32>
    %85 = vector.shape_cast %84 : vector<2x8xf32> to vector<2x8x1xf32>
    %86 = tpu.reciprocal %85 {approx = true} : vector<2x8x1xf32> -> vector<2x8x1xf32>
    %87 = vector.broadcast %86 : vector<2x8x1xf32> to vector<2x8x8xf32>
    %88 = arith.mulf %83, %87 : vector<2x8x8xf32>
    %89 = arith.truncf %88 : vector<2x8x8xf32> to vector<2x8x8xbf16>
    "tpu.trace_start"() <{level = 10 : i32, message = "bqk,bkd->bqd"}> : () -> ()
    %cst_27 = arith.constant dense<0.000000e+00> : vector<2x8x8xf32>
    %90 = tpu.matmul %89, %74, %cst_27 {dimension_numbers = #tpu.dot_dimension_numbers<[2], [1], [1], [2], [0, 0, 0, 1, 1, 2], [0], [0]>} : vector<2x8x8xbf16>, vector<2x8x8xbf16>, vector<2x8x8xf32> -> vector<2x8x8xf32>
    "tpu.trace_stop"() : () -> ()
    %91 = vector.extract_strided_slice %32 {offsets = [0, 0, 24], sizes = [2, 8, 8], strides = [1, 1, 1]} : vector<2x8x96xbf16> to vector<2x8x8xbf16>
    %92 = vector.extract_strided_slice %32 {offsets = [0, 0, 56], sizes = [2, 8, 8], strides = [1, 1, 1]} : vector<2x8x96xbf16> to vector<2x8x8xbf16>
    %93 = vector.extract_strided_slice %32 {offsets = [0, 0, 88], sizes = [2, 8, 8], strides = [1, 1, 1]} : vector<2x8x96xbf16> to vector<2x8x8xbf16>
    "tpu.trace_start"() <{level = 10 : i32, message = "bqd,bkd->bqk"}> : () -> ()
    %cst_28 = arith.constant dense<0.000000e+00> : vector<2x8x8xf32>
    %94 = tpu.matmul %91, %92, %cst_28 {dimension_numbers = #tpu.dot_dimension_numbers<[2], [2], [1], [1], [0, 0, 0, 1, 1, 1], [0], [0]>} : vector<2x8x8xbf16>, vector<2x8x8xbf16>, vector<2x8x8xf32> -> vector<2x8x8xf32>
    "tpu.trace_stop"() : () -> ()
    %95 = vector.shape_cast %33 : vector<8x8xf32> to vector<1x8x8xf32>
    %96 = vector.broadcast %95 : vector<1x8x8xf32> to vector<2x8x8xf32>
    %97 = arith.addf %94, %96 : vector<2x8x8xf32>
    %cst_29 = arith.constant dense<0xFF800000> : vector<2x8xf32>
    %98 = vector.multi_reduction <maximumf>, %97, %cst_29 [2] : vector<2x8x8xf32> to vector<2x8xf32>
    %99 = vector.shape_cast %98 : vector<2x8xf32> to vector<2x8x1xf32>
    %100 = vector.broadcast %99 : vector<2x8x1xf32> to vector<2x8x8xf32>
    %101 = arith.subf %97, %100 : vector<2x8x8xf32>
    %102 = math.exp %101 : vector<2x8x8xf32>
    %cst_30 = arith.constant dense<0.000000e+00> : vector<2x8xf32>
    %103 = vector.multi_reduction <add>, %102, %cst_30 [2] : vector<2x8x8xf32> to vector<2x8xf32>
    %104 = vector.shape_cast %103 : vector<2x8xf32> to vector<2x8x1xf32>
    %105 = tpu.reciprocal %104 {approx = true} : vector<2x8x1xf32> -> vector<2x8x1xf32>
    %106 = vector.broadcast %105 : vector<2x8x1xf32> to vector<2x8x8xf32>
    %107 = arith.mulf %102, %106 : vector<2x8x8xf32>
    %108 = arith.truncf %107 : vector<2x8x8xf32> to vector<2x8x8xbf16>
    "tpu.trace_start"() <{level = 10 : i32, message = "bqk,bkd->bqd"}> : () -> ()
    %cst_31 = arith.constant dense<0.000000e+00> : vector<2x8x8xf32>
    %109 = tpu.matmul %108, %93, %cst_31 {dimension_numbers = #tpu.dot_dimension_numbers<[2], [1], [1], [2], [0, 0, 0, 1, 1, 2], [0], [0]>} : vector<2x8x8xbf16>, vector<2x8x8xbf16>, vector<2x8x8xf32> -> vector<2x8x8xf32>
    "tpu.trace_stop"() : () -> ()
    %110 = tpu.concatenate %52, %71, %90, %109 in 2 : vector<2x8x8xf32>, vector<2x8x8xf32>, vector<2x8x8xf32>, vector<2x8x8xf32> -> vector<2x8x32xf32>
    %111 = vector.shape_cast %110 : vector<2x8x32xf32> to vector<16x32xf32>
    %112 = arith.truncf %111 : vector<16x32xf32> to vector<16x32xbf16>
    %c0_32 = arith.constant 0 : index
    %c0_33 = arith.constant 0 : index
    %113 = vector.load %arg7[%c0_32, %c0_33] : memref<32x32xbf16, #tpu.memory_space<vmem>>, vector<32x32xbf16>
    %cst_34 = arith.constant dense<0.000000e+00> : vector<16x32xf32>
    %114 = tpu.matmul %112, %113, %cst_34 {dimension_numbers = #tpu.dot_dimension_numbers<[1], [0], [0], [1], [0, 0, 1, 1], [], []>} : vector<16x32xbf16>, vector<32x32xbf16>, vector<16x32xf32> -> vector<16x32xf32>
    %c0_35 = arith.constant 0 : index
    %c0_36 = arith.constant 0 : index
    %115 = vector.load %arg8[%c0_35, %c0_36] : memref<1x32xf32, #tpu.memory_space<vmem>>, vector<1x32xf32>
    %116 = vector.broadcast %115 : vector<1x32xf32> to vector<16x32xf32>
    %117 = arith.addf %114, %116 : vector<16x32xf32>
    %118 = arith.addf %0, %117 : vector<16x32xf32>
    %c0_37 = arith.constant 0 : index
    %c0_38 = arith.constant 0 : index
    %119 = vector.load %arg9[%c0_37, %c0_38] : memref<1x32xf32, #tpu.memory_space<vmem>>, vector<1x32xf32>
    %c0_39 = arith.constant 0 : index
    %c0_40 = arith.constant 0 : index
    %120 = vector.load %arg10[%c0_39, %c0_40] : memref<1x32xf32, #tpu.memory_space<vmem>>, vector<1x32xf32>
    %cst_41 = arith.constant dense<0.000000e+00> : vector<16xf32>
    %121 = vector.multi_reduction <add>, %118, %cst_41 [1] : vector<16x32xf32> to vector<16xf32>
    %122 = vector.shape_cast %121 : vector<16xf32> to vector<16x1xf32>
    %cst_42 = arith.constant 3.200000e+01 : f32
    %123 = vector.broadcast %cst_42 : f32 to vector<16x1xf32>
    %124 = arith.divf %122, %123 : vector<16x1xf32>
    %125 = vector.broadcast %124 : vector<16x1xf32> to vector<16x32xf32>
    %126 = arith.subf %118, %125 : vector<16x32xf32>
    %127 = arith.mulf %126, %126 : vector<16x32xf32>
    %cst_43 = arith.constant dense<0.000000e+00> : vector<16xf32>
    %128 = vector.multi_reduction <add>, %127, %cst_43 [1] : vector<16x32xf32> to vector<16xf32>
    %129 = vector.shape_cast %128 : vector<16xf32> to vector<16x1xf32>
    %cst_44 = arith.constant 3.200000e+01 : f32
    %130 = vector.broadcast %cst_44 : f32 to vector<16x1xf32>
    %131 = arith.divf %129, %130 : vector<16x1xf32>
    %132 = vector.broadcast %124 : vector<16x1xf32> to vector<16x32xf32>
    %133 = arith.subf %118, %132 : vector<16x32xf32>
    %cst_45 = arith.constant 9.99999974E-6 : f32
    %134 = vector.broadcast %cst_45 : f32 to vector<16x1xf32>
    %135 = arith.addf %131, %134 : vector<16x1xf32>
    %136 = math.rsqrt %135 : vector<16x1xf32>
    %137 = vector.broadcast %136 : vector<16x1xf32> to vector<16x32xf32>
    %138 = arith.mulf %133, %137 : vector<16x32xf32>
    %139 = vector.broadcast %119 : vector<1x32xf32> to vector<16x32xf32>
    %140 = arith.mulf %138, %139 : vector<16x32xf32>
    %141 = vector.broadcast %120 : vector<1x32xf32> to vector<16x32xf32>
    %142 = arith.addf %140, %141 : vector<16x32xf32>
    %143 = arith.truncf %142 : vector<16x32xf32> to vector<16x32xbf16>
    %c0_46 = arith.constant 0 : index
    %c0_47 = arith.constant 0 : index
    %144 = vector.load %arg11[%c0_46, %c0_47] : memref<32x128xbf16, #tpu.memory_space<vmem>>, vector<32x128xbf16>
    %cst_48 = arith.constant dense<0.000000e+00> : vector<16x128xf32>
    %145 = tpu.matmul %143, %144, %cst_48 {dimension_numbers = #tpu.dot_dimension_numbers<[1], [0], [0], [1], [0, 0, 1, 1], [], []>} : vector<16x32xbf16>, vector<32x128xbf16>, vector<16x128xf32> -> vector<16x128xf32>
    %c0_49 = arith.constant 0 : index
    %c0_50 = arith.constant 0 : index
    %146 = vector.load %arg12[%c0_49, %c0_50] : memref<1x128xf32, #tpu.memory_space<vmem>>, vector<1x128xf32>
    %147 = vector.broadcast %146 : vector<1x128xf32> to vector<16x128xf32>
    %148 = arith.addf %145, %147 : vector<16x128xf32>
    %149 = arith.mulf %148, %148 : vector<16x128xf32>
    %150 = arith.mulf %148, %149 : vector<16x128xf32>
    %cst_51 = arith.constant 4.471500e-02 : f32
    %151 = vector.broadcast %cst_51 : f32 to vector<16x128xf32>
    %152 = arith.mulf %151, %150 : vector<16x128xf32>
    %153 = arith.addf %148, %152 : vector<16x128xf32>
    %cst_52 = arith.constant 0.797884583 : f32
    %154 = vector.broadcast %cst_52 : f32 to vector<16x128xf32>
    %155 = arith.mulf %154, %153 : vector<16x128xf32>
    %156 = math.tanh %155 : vector<16x128xf32>
    %cst_53 = arith.constant 1.000000e+00 : f32
    %157 = vector.broadcast %cst_53 : f32 to vector<16x128xf32>
    %158 = arith.addf %157, %156 : vector<16x128xf32>
    %cst_54 = arith.constant 5.000000e-01 : f32
    %159 = vector.broadcast %cst_54 : f32 to vector<16x128xf32>
    %160 = arith.mulf %159, %158 : vector<16x128xf32>
    %161 = arith.mulf %148, %160 : vector<16x128xf32>
    %162 = arith.truncf %161 : vector<16x128xf32> to vector<16x128xbf16>
    %c0_55 = arith.constant 0 : index
    %c0_56 = arith.constant 0 : index
    %163 = vector.load %arg13[%c0_55, %c0_56] : memref<128x32xbf16, #tpu.memory_space<vmem>>, vector<128x32xbf16>
    %cst_57 = arith.constant dense<0.000000e+00> : vector<16x32xf32>
    %164 = tpu.matmul %162, %163, %cst_57 {dimension_numbers = #tpu.dot_dimension_numbers<[1], [0], [0], [1], [0, 0, 1, 1], [], []>} : vector<16x128xbf16>, vector<128x32xbf16>, vector<16x32xf32> -> vector<16x32xf32>
    %c0_58 = arith.constant 0 : index
    %c0_59 = arith.constant 0 : index
    %165 = vector.load %arg14[%c0_58, %c0_59] : memref<1x32xf32, #tpu.memory_space<vmem>>, vector<1x32xf32>
    %166 = vector.broadcast %165 : vector<1x32xf32> to vector<16x32xf32>
    %167 = arith.addf %164, %166 : vector<16x32xf32>
    %168 = arith.addf %118, %167 : vector<16x32xf32>
    %c0_60 = arith.constant 0 : index
    %c0_61 = arith.constant 0 : index
    %169 = vector.load %arg15[%c0_60, %c0_61] : memref<16x32xf32, #tpu.memory_space<vmem>>, vector<16x32xf32>
    tpu.vector_store %arg15[%c0_60, %c0_61], %168 {strides = array<i32>} : memref<16x32xf32, #tpu.memory_space<vmem>>, vector<16x32xf32>,
    return
  }
  func.func @transform_0(%arg0: i32) -> (i32, i32) {
    %c0_i32 = arith.constant 0 : i32
    %c0_i32_0 = arith.constant 0 : i32
    %c0_i32_1 = arith.constant 0 : i32
    return %c0_i32, %c0_i32_0 : i32, i32
  }
  func.func @transform_1(%arg0: i32) -> (i32, i32) {
    %c0_i32 = arith.constant 0 : i32
    %c0_i32_0 = arith.constant 0 : i32
    %c0_i32_1 = arith.constant 0 : i32
    return %c0_i32, %c0_i32_0 : i32, i32
  }
  func.func @transform_2(%arg0: i32) -> (i32, i32) {
    %c0_i32 = arith.constant 0 : i32
    %c0_i32_0 = arith.constant 0 : i32
    %c0_i32_1 = arith.constant 0 : i32
    return %c0_i32, %c0_i32_0 : i32, i32
  }
  func.func @transform_3(%arg0: i32) -> (i32, i32) {
    %c0_i32 = arith.constant 0 : i32
    %c0_i32_0 = arith.constant 0 : i32
    %c0_i32_1 = arith.constant 0 : i32
    return %c0_i32, %c0_i32_0 : i32, i32
  }
  func.func @transform_4(%arg0: i32) -> (i32, i32) {
    %c0_i32 = arith.constant 0 : i32
    %c0_i32_0 = arith.constant 0 : i32
    %c0_i32_1 = arith.constant 0 : i32
    return %c0_i32, %c0_i32_0 : i32, i32
  }
  func.func @transform_5(%arg0: i32) -> (i32, i32) {
    %c0_i32 = arith.constant 0 : i32
    %c0_i32_0 = arith.constant 0 : i32
    %c0_i32_1 = arith.constant 0 : i32
    return %c0_i32, %c0_i32_0 : i32, i32
  }
  func.func @transform_6(%arg0: i32) -> (i32, i32) {
    %c0_i32 = arith.constant 0 : i32
    %c0_i32_0 = arith.constant 0 : i32
    %c0_i32_1 = arith.constant 0 : i32
    return %c0_i32, %c0_i32_0 : i32, i32
  }
  func.func @transform_7(%arg0: i32) -> (i32, i32) {
    %c0_i32 = arith.constant 0 : i32
    %c0_i32_0 = arith.constant 0 : i32
    %c0_i32_1 = arith.constant 0 : i32
    return %c0_i32, %c0_i32_0 : i32, i32
  }
  func.func @transform_8(%arg0: i32) -> (i32, i32) {
    %c0_i32 = arith.constant 0 : i32
    %c0_i32_0 = arith.constant 0 : i32
    %c0_i32_1 = arith.constant 0 : i32
    return %c0_i32, %c0_i32_0 : i32, i32
  }
  func.func @transform_9(%arg0: i32) -> (i32, i32) {
    %c0_i32 = arith.constant 0 : i32
    %c0_i32_0 = arith.constant 0 : i32
    %c0_i32_1 = arith.constant 0 : i32
    return %c0_i32, %c0_i32_0 : i32, i32
  }
  func.func @transform_10(%arg0: i32) -> (i32, i32) {
    %c0_i32 = arith.constant 0 : i32
    %c0_i32_0 = arith.constant 0 : i32
    %c0_i32_1 = arith.constant 0 : i32
    return %c0_i32, %c0_i32_0 : i32, i32
  }
  func.func @transform_11(%arg0: i32) -> (i32, i32) {
    %c0_i32 = arith.constant 0 : i32
    %c0_i32_0 = arith.constant 0 : i32
    %c0_i32_1 = arith.constant 0 : i32
    return %c0_i32, %c0_i32_0 : i32, i32
  }
  func.func @transform_12(%arg0: i32) -> (i32, i32) {
    %c0_i32 = arith.constant 0 : i32
    %c0_i32_0 = arith.constant 0 : i32
    %c0_i32_1 = arith.constant 0 : i32
    return %c0_i32, %c0_i32_0 : i32, i32
  }
  func.func @transform_13(%arg0: i32) -> (i32, i32) {
    %c0_i32 = arith.constant 0 : i32
    %c0_i32_0 = arith.constant 0 : i32
    %c0_i32_1 = arith.constant 0 : i32
    return %c0_i32, %c0_i32_0 : i32, i32
  }
  func.func @transform_14(%arg0: i32) -> (i32, i32) {
    %c0_i32 = arith.constant 0 : i32
    %c0_i32_0 = arith.constant 0 : i32
    %c0_i32_1 = arith.constant 0 : i32
    return %c0_i32, %c0_i32_0 : i32, i32
  }
}

</mosaic_0001>

<bundles_post_ra>
// kernel: tpu_custom_call.1
= control target key start
LH: loop header
LB: loop body
LE: loop exit
PB: predicated region body
PF: predicated region fallthrough
CT: control target
= control target key end

     0   :  { %vm53_vm0 = vcmask 261120   ;;  %s2147_s0 = inlined_call_operand.vmem [shape: f32[16,32], index: 0, kind: input, shape index: {}]   ;;  %s2148_s1 = inlined_call_operand.vmem [shape: f32[8,8], index: 1, kind: input, shape index: {}]   ;;  %s2149_s2 = inlined_call_operand.vmem [shape: f32[1,32], index: 2, kind: input, shape index: {}]   ;;  %s2150_s3 = inlined_call_operand.vmem [shape: f32[1,32], index: 3, kind: input, shape index: {}]   ;;  %s2151_s4 = inlined_call_operand.vmem [shape: bf16[32,96], index: 4, kind: input, shape index: {}]   ;;  %s2152_s5 = inlined_call_operand.vmem [shape: f32[1,96], index: 5, kind: input, shape index: {}]   ;;  %s2153_s6 = inlined_call_operand.vmem [shape: bf16[32,32], index: 6, kind: input, shape index: {}]   ;;  %s2154_s7 = inlined_call_operand.vmem [shape: f32[1,32], index: 7, kind: input, shape index: {}]   ;;  %s2155_s8 = inlined_call_operand.vmem [shape: f32[1,32], index: 8, kind: input, shape index: {}]   ;;  %s2156_s9 = inlined_call_operand.vmem [shape: f32[1,32], index: 9, kind: input, shape index: {}]   ;;  %s2157_s10 = inlined_call_operand.vmem [shape: bf16[32,128], index: 10, kind: input, shape index: {}]   ;;  %s2158_s11 = inlined_call_operand.vmem [shape: f32[1,128], index: 11, kind: input, shape index: {}]   ;;  %s2159_s12 = inlined_call_operand.vmem [shape: bf16[128,32], index: 12, kind: input, shape index: {}]   ;;  %s2160_s13 = inlined_call_operand.vmem [shape: f32[1,32], index: 13, kind: input, shape index: {}]   ;;  %s2161_s14 = inlined_call_operand.hbm [shape: f32[16,32], index: 14, kind: output, shape index: {}]  }
   0x1   :  { %v1855_v0 = vld [vmem:[%s2147_s0] sm:$0xff]  ;;  %v1860_v1 = vld [vmem:[%s2147_s0 + $0x8] sm:$0xff] }
   0x2   :  { %v54_v2 = vsel %vm53_vm0, %v1855_v0, 0.0  ;;  %v57_v3 = vsel %vm53_vm0, %v1860_v1, 0.0 }
   0x3   :  { %55 = vadd.xlane.f32.xlu0 %v54_v2 }
   0x7   :  { %58 = vadd.xlane.f32.xlu0 %v57_v3 }
   0x8   :  { %19 = vsyncpa [#allocation3], 0  ;;  %v1677_v14 = vld [vmem:[%s2151_s4] sm:$0xff]   ;;  %v1759_v15 = vmov 0.0   ;;  %v1678_v16 = vld [vmem:[%s2151_s4 + $0x8] sm:$0xff]   ;;  %vm1760_vm1 = vmmov 0  }
   0x9   :  { %1504 = vmatprep.subr.bf16.mxu0 %v1759_v15  ;;  %1524 = vmatprep.subr.bf16.mxu1 %v1759_v15  ;;  %v1413_v25 = vld [vmem:[%s2149_s2] ss:$0 sm:$0xff]  ;;  %s1761_s2 = smov 96   ;;  %vm171_vm2 = vcmask 64512   ;;  %s1763_s25 = smov 88   ;;  %vm296_vm3 = vcmask 1043456  }
   0xa   :  { %1505 = vmatpush3.bf16.msra.mxu0 %v1677_v14  ;;  %1508 = vmatprep.mubr.msk.bf16.mxu0 %vm1760_vm1, %v1759_v15  ;;  %v1414_v29 = vld [vmem:[%s2150_s3] ss:$0 sm:$0xff]  ;;  %s1764_s26 = smov 120   ;;  %s1765_s27 = smov 56   ;;  %vm1074_vm4 = vcmask 130048   ;;  %vm1077_vm5 = vcmask 195584  }
   0xb   :  { %1506 = vmatprep.subr.bf16.mxu0 %v1759_v15  ;;  %1526 = vmatprep.mubr.msk.bf16.mxu1 %vm1760_vm1, %v1759_v15  ;;  %v1415_v34 = vld [vmem:[%s2152_s5] ss:$0 sm:$0xff]  ;;  %s1766_s28 = smov 80   ;;  %s1767_s29 = smov 112  }
   0xc   :  { %v1917_v47 = vld [vmem:[%s2148_s1] sm:$0xff]  ;;  %s1762_s1 = smov 64   ;;  %s1768_s30 = smov 48  }
   0xd   :  { %s1769_s15 = smov 72   ;;  %s1770_s16 = smov 104  }
   0xe   :  { %1507 = vmatpush3.bf16.msra.mxu0 %v1678_v16  ;;  %s1771_s0 = smov 40   ;;  %s1772_s17 = smov 8  }
   0xf   :  { %1512 = vmatprep.subr.bf16.mxu0 %v1759_v15  ;;  %s1773_s18 = smov 16   ;;  %s1774_s22 = smov 24  }
  0x90   :  { %v56_v4 = vpop.xlane.xlu0 %55 }
  0x91   :  { %v61_v5 = vmul.f32 0.03125, %v56_v4 }
  0x93   :  { %v63_v6 = vsub.f32 %v1855_v0, %v61_v5 }
  0x94   :  { %v59_v7 = vpop.xlane.xlu0 %58 }
  0x95   :  { %v62_v8 = vmul.f32 0.03125, %v59_v7  ;;  %v65_v9 = vmul.f32 %v63_v6, %v63_v6 }
  0x97   :  { %v64_v10 = vsub.f32 %v1860_v1, %v62_v8  ;;  %v67_v11 = vsel %vm53_vm0, %v65_v9, 0.0 }
  0x98   :  { %68 = vadd.xlane.f32.xlu1 %v67_v11 }
  0x99   :  { %v66_v12 = vmul.f32 %v64_v10, %v64_v10 }
  0x9b   :  { %v70_v13 = vsel %vm53_vm0, %v66_v12, 0.0 }
  0x9c   :  { %71 = vadd.xlane.f32.xlu1 %v70_v13 }
 0x125   :  { %v69_v17 = vpop.xlane.xlu1 %68 }
 0x126   :  { %v73_v18 = vmul.f32 0.03125, %v69_v17 }
 0x128   :  { %v75_v19 = vadd.f32 1e-05, %v73_v18 }
 0x129   :  { %v72_v20 = vpop.xlane.xlu1 %71 }
 0x12a   :  { %1691 = vrsqrt.f32 %v75_v19  ;;  %v74_v21 = vmul.f32 0.03125, %v72_v20 }
 0x12c   :  { %v76_v22 = vadd.f32 1e-05, %v74_v21 }
 0x12e   :  { %1693 = vrsqrt.f32 %v76_v22 }
 0x134   :  { %v1692_v23 = vpop.eup %1691 }
 0x135   :  { %v79_v24 = vmul.f32 %v1692_v23, %v63_v6 }
 0x137   :  { %v87_v28 = vmul.f32 %v1413_v25, %v79_v24 }
 0x138   :  { %v1694_v26 = vpop.eup %1693 }
 0x139   :  { %v80_v27 = vmul.f32 %v1694_v26, %v64_v10  ;;  %v95_v31 = vadd.f32 %v1414_v29, %v87_v28 }
 0x13b   :  { %v88_v30 = vmul.f32 %v1413_v25, %v80_v27 }
 0x13d   :  { %v96_v32 = vadd.f32 %v1414_v29, %v88_v30 }
 0x13f   :  { %v97_v33 = vpack.c.bf16 %v96_v32, %v95_v31 }
 0x141   :  { %1509 = vmatmul.mubr.msk.bf16.vlgmr.msra.gmra.mrb[0].mxu0 %vm53_vm0, %v97_v33 }
 0x142   :  { %1514 = vmatprep.mubr.msk.bf16.mxu0 %vm1760_vm1, %v1759_v15 }
 0x214   :  { %v158_v35 = vpop.f32.mrb[0].mxu0 }
 0x215   :  { %v159_v36 = vadd.f32 %v1415_v34, %v158_v35  ;;  %v1510_v37 = vpop.f32.mrb[1].mxu0 }
 0x216   :  { %v161_v38 = vpop.f32.mrb[2].mxu0 }
 0x217   :  { %v1896_v39 = vpack.c.bf16 %v159_v36, %v159_v36  ;;  %v162_v40 = vadd.f32 %v1415_v34, %v161_v38  ;;  %v1511_v41 = vpop.f32.mrb[3].mxu0 }
 0x219   :  { %v1898_v42 = vpack.c.bf16 %v162_v40, %v162_v40  ;;  %169 = vrot.lane.b32.xlu0 %v1896_v39, %s1761_s2 }
 0x21b   :  { %219 = vrot.lane.b32.xlu1 %v1898_v42, %s1761_s2 }
 0x28b   :  { %v170_v43 = vpop.permute.xlu0 %169 }
 0x28c   :  { %v176_v44 = vsel %vm171_vm2, %v170_v43, 0 }
 0x28d   :  { %1513 = vmatpush3.bf16.xpose.msra.mxu0 %v176_v44  ;;  %v220_v45 = vpop.permute.xlu1 %219 }
 0x28e   :  { %1518 = vmatprep.subr.bf16.mxu0 %v1759_v15  ;;  %v225_v46 = vsel %vm171_vm2, %v220_v45, 0 }
 0x294   :  { %1515 = vmatmul.mubr.msk.bf16.vlgmr.msra.gmra.mrb[4].mxu0 %vm171_vm2, %v1896_v39 }
 0x295   :  { %1519 = vmatpush3.bf16.xpose.msra.mxu0 %v225_v46  ;;  %1520 = vmatprep.mubr.msk.bf16.mxu0 %vm1760_vm1, %v1759_v15 }
 0x296   :  { %1530 = vmatprep.subr.bf16.mxu0 %v1759_v15 }
 0x29c   :  { %1521 = vmatmul.mubr.msk.bf16.vlgmr.msra.gmra.mrb[8].mxu0 %vm171_vm2, %v1898_v42 }
 0x29d   :  { %1532 = vmatprep.mubr.msk.bf16.mxu0 %vm1760_vm1, %v1759_v15 }
 0x367   :  { %v212_v48 = vpop.f32.mrb[4].mxu0 }
 0x368   :  { %v213_v49 = vadd.f32 %v212_v48, %v1917_v47  ;;  %v1516_v50 = vpop.f32.mrb[5].mxu0 }
 0x369   :  { %v215_v51 = vpop.f32.mrb[6].mxu0 }
 0x36a   :  { %v1517_v52 = vpop.f32.mrb[7].mxu0  ;;  %v267_v53 = vsel %vm171_vm2, %v213_v49, -inf }
 0x36b   :  { %268 = vmax.xlane.f32.xlu1 %v267_v53 }
 0x36f   :  { %v261_v54 = vpop.f32.mrb[8].mxu0 }
 0x370   :  { %v262_v55 = vadd.f32 %v261_v54, %v1917_v47  ;;  %v1522_v56 = vpop.f32.mrb[9].mxu0 }
 0x371   :  { %v264_v57 = vpop.f32.mrb[10].mxu0 }
 0x372   :  { %v1523_v58 = vpop.f32.mrb[11].mxu0  ;;  %v270_v59 = vsel %vm171_vm2, %v262_v55, -inf }
 0x373   :  { %271 = vmax.xlane.f32.xlu0 %v270_v59 }
 0x37c   :  { %340 = vrot.lane.b32.xlu1 %v1898_v42, %s1762_s1 }
 0x380   :  { %390 = vrot.lane.b32.xlu1 %v1896_v39, %s1763_s25 }
 0x3f8   :  { %v269_v60 = vpop.xlane.xlu1 %268 }
 0x3f9   :  { %v273_v61 = vsub.f32 %v213_v49, %v269_v60 }
 0x3fb   :  { %v275_v62 = vmul.f32 1.442695, %v273_v61 }
 0x3fc   :  { %v341_v63 = vpop.permute.xlu1 %340 }
 0x3fd   :  { %1695 = vpow2.f32 %v275_v62  ;;  %v346_v2 = vsel %vm296_vm3, %v341_v63, 0 }
 0x3fe   :  { %1531 = vmatpush3.bf16.msra.mxu0 %v346_v2 }
 0x3ff   :  { %1542 = vmatprep.subr.bf16.mxu0 %v1759_v15 }
 0x400   :  { %v272_v3 = vpop.xlane.xlu0 %271  ;;  %v391_v11 = vpop.permute.xlu1 %390 }
 0x401   :  { %v274_v4 = vsub.f32 %v262_v55, %v272_v3  ;;  %v396_v19 = vsel %vm171_vm2, %v391_v11, 0 }
 0x403   :  { %v277_v5 = vmul.f32 1.442695, %v274_v4 }
 0x405   :  { %1697 = vpow2.f32 %v277_v5 }
 0x407   :  { %v1696_v6 = vpop.eup %1695 }
 0x408   :  { %v279_v7 = vsel %vm171_vm2, %v1696_v6, 0.0 }
 0x409   :  { %280 = vadd.xlane.f32.xlu0 %v279_v7 }
 0x40f   :  { %v1698_v8 = vpop.eup %1697 }
 0x410   :  { %v282_v9 = vsel %vm171_vm2, %v1698_v8, 0.0 }
 0x411   :  { %283 = vadd.xlane.f32.xlu1 %v282_v9 }
 0x41f   :  { %291 = vrot.lane.b32.xlu0 %v1896_v39, %s1762_s1 }
 0x422   :  { %440 = vrot.lane.b32.xlu1 %v1898_v42, %s1763_s25 }
 0x423   :  { %388 = vrot.lane.b32.xlu0 %v1896_v39, %s1764_s26 }
 0x426   :  { %438 = vrot.lane.b32.xlu1 %v1898_v42, %s1764_s26 }
 0x496   :  { %v281_v10 = vpop.xlane.xlu0 %280 }
 0x497   :  { %1699 = vrcp.f32 %v281_v10 }
 0x49a   :  { %v292_v12 = vpop.permute.xlu0 %291 }
 0x49b   :  { %v298_v13 = vsel %vm296_vm3, %v292_v12, 0 }
 0x49c   :  { %1525 = vmatpush3.bf16.msra.mxu1 %v298_v13 }
 0x49d   :  { %1536 = vmatprep.subr.bf16.mxu1 %v1759_v15 }
 0x49e   :  { %v284_v14 = vpop.xlane.xlu1 %283  ;;  %v389_v24 = vpop.permute.xlu0 %388 }
 0x49f   :  { %1701 = vrcp.f32 %v284_v14 }
 0x4a1   :  { %v1700_v16 = vpop.eup %1699 }
 0x4a2   :  { %v287_v17 = vmul.f32 %v1700_v16, %v1696_v6  ;;  %v441_v22 = vpop.permute.xlu1 %440 }
 0x4a3   :  { %v446_v25 = vsel %vm171_vm2, %v441_v22, 0 }
 0x4a4   :  { %v289_v18 = vpack.c.bf16 %v287_v17, %v287_v17 }
 0x4a6   :  { %1527 = vmatmul.mubr.msk.bf16.vlgmr.msra.gmra.mrb[0].mxu1 %vm171_vm2, %v289_v18  ;;  %v439_v26 = vpop.permute.xlu1 %438 }
 0x4a7   :  { %1537 = vmatpush3.bf16.xpose.msra.mxu1 %v396_v19  ;;  %1538 = vmatprep.mubr.msk.bf16.mxu1 %vm1760_vm1, %v1759_v15 }
 0x4a8   :  { %1548 = vmatprep.subr.bf16.mxu1 %v1759_v15 }
 0x4a9   :  { %v1702_v20 = vpop.eup %1701 }
 0x4aa   :  { %v288_v21 = vmul.f32 %v1702_v20, %v1698_v8 }
 0x4ac   :  { %v290_v23 = vpack.c.bf16 %v288_v21, %v288_v21 }
 0x4ae   :  { %1533 = vmatmul.mubr.msk.bf16.vlgmr.msra.gmra.mrb[12].mxu0 %vm171_vm2, %v290_v23  ;;  %1539 = vmatmul.mubr.msk.bf16.vlgmr.msra.gmra.mrb[4].mxu1 %vm171_vm2, %v389_v24 }
 0x4af   :  { %1543 = vmatpush3.bf16.xpose.msra.mxu0 %v446_v25  ;;  %1544 = vmatprep.mubr.msk.bf16.mxu0 %vm1760_vm1, %v1759_v15 }
 0x4b0   :  { %1554 = vmatprep.subr.bf16.mxu0 %v1759_v15  ;;  %1550 = vmatprep.mubr.msk.bf16.mxu1 %vm1760_vm1, %v1759_v15 }
 0x4b6   :  { %1545 = vmatmul.mubr.msk.bf16.vlgmr.msra.gmra.mrb[16].mxu0 %vm171_vm2, %v439_v26 }
 0x4b7   :  { %1556 = vmatprep.mubr.msk.bf16.mxu0 %vm1760_vm1, %v1759_v15 }
 0x579   :  { %v1951_v27 = vpop.f32.mrb[0].mxu1 }
 0x57a   :  { %v1528_v28 = vpop.f32.mrb[1].mxu1 }
 0x57b   :  { %v337_v29 = vpop.f32.mrb[2].mxu1 }
 0x57c   :  { %v1529_v30 = vpop.f32.mrb[3].mxu1 }
 0x581   :  { %v1953_v31 = vpop.f32.mrb[12].mxu0  ;;  %v432_v32 = vpop.f32.mrb[4].mxu1 }
 0x582   :  { %v433_v33 = vadd.f32 %v432_v32, %v1917_v47  ;;  %v1534_v34 = vpop.f32.mrb[13].mxu0  ;;  %v1540_v35 = vpop.f32.mrb[5].mxu1 }
 0x583   :  { %v385_v36 = vpop.f32.mrb[14].mxu0  ;;  %v435_v37 = vpop.f32.mrb[6].mxu1 }
 0x584   :  { %v1535_v38 = vpop.f32.mrb[15].mxu0  ;;  %v1541_v40 = vpop.f32.mrb[7].mxu1  ;;  %v488_v41 = vsel %vm171_vm2, %v433_v33, -inf }
 0x585   :  { %489 = vmax.xlane.f32.xlu0 %v488_v41 }
 0x589   :  { %v482_v43 = vpop.f32.mrb[16].mxu0 }
 0x58a   :  { %v483_v44 = vadd.f32 %v482_v43, %v1917_v47  ;;  %v1546_v45 = vpop.f32.mrb[17].mxu0 }
 0x58b   :  { %v485_v46 = vpop.f32.mrb[18].mxu0 }
 0x58c   :  { %v1547_v48 = vpop.f32.mrb[19].mxu0  ;;  %v491_v49 = vsel %vm171_vm2, %v483_v44, -inf }
 0x58d   :  { %492 = vmax.xlane.f32.xlu1 %v491_v49 }
 0x59e   :  { %560 = vrot.lane.b32.xlu1 %v1898_v42, %s1765_s27 }
 0x5a2   :  { %610 = vrot.lane.b32.xlu1 %v1896_v39, %s1766_s28 }
 0x5a6   :  { %660 = vrot.lane.b32.xlu1 %v1898_v42, %s1766_s28 }
 0x5aa   :  { %658 = vrot.lane.b32.xlu1 %v1898_v42, %s1767_s29 }
 0x612   :  { %v490_v50 = vpop.xlane.xlu0 %489 }
 0x613   :  { %v494_v51 = vsub.f32 %v433_v33, %v490_v50 }
 0x615   :  { %v496_v52 = vmul.f32 1.442695, %v494_v51 }
 0x617   :  { %1703 = vpow2.f32 %v496_v52 }
 0x61a   :  { %v493_v53 = vpop.xlane.xlu1 %492 }
 0x61b   :  { %v495_v54 = vsub.f32 %v483_v44, %v493_v53 }
 0x61d   :  { %v498_v55 = vmul.f32 1.442695, %v495_v54 }
 0x61e   :  { %v561_v56 = vpop.permute.xlu1 %560 }
 0x61f   :  { %1705 = vpow2.f32 %v498_v55  ;;  %v566_v57 = vsel %vm296_vm3, %v561_v56, 0 }
 0x620   :  { %1555 = vmatpush3.bf16.msra.mxu0 %v566_v57 }
 0x621   :  { %v1704_v58 = vpop.eup %1703  ;;  %1566 = vmatprep.subr.bf16.mxu0 %v1759_v15 }
 0x622   :  { %v500_v59 = vsel %vm171_vm2, %v1704_v58, 0.0  ;;  %v611_v7 = vpop.permute.xlu1 %610 }
 0x623   :  { %501 = vadd.xlane.f32.xlu0 %v500_v59  ;;  %v616_v11 = vsel %vm171_vm2, %v611_v7, 0 }
 0x626   :  { %v661_v10 = vpop.permute.xlu1 %660 }
 0x627   :  { %v666_v13 = vsel %vm171_vm2, %v661_v10, 0 }
 0x629   :  { %v1706_v60 = vpop.eup %1705 }
 0x62a   :  { %v503_v61 = vsel %vm171_vm2, %v1706_v60, 0.0  ;;  %v659_v16 = vpop.permute.xlu1 %658 }
 0x62b   :  { %504 = vadd.xlane.f32.xlu0 %v503_v61 }
 0x641   :  { %512 = vrot.lane.b32.xlu0 %v1896_v39, %s1765_s27 }
 0x645   :  { %608 = vrot.lane.b32.xlu0 %v1896_v39, %s1767_s29 }
 0x6b0   :  { %v502_v62 = vpop.xlane.xlu0 %501 }
 0x6b1   :  { %1707 = vrcp.f32 %v502_v62 }
 0x6b8   :  { %v505_v63 = vpop.xlane.xlu0 %504 }
 0x6b9   :  { %1709 = vrcp.f32 %v505_v63 }
 0x6bb   :  { %v1708_v2 = vpop.eup %1707 }
 0x6bc   :  { %v508_v3 = vmul.f32 %v1708_v2, %v1704_v58  ;;  %v513_v4 = vpop.permute.xlu0 %512 }
 0x6bd   :  { %v518_v5 = vsel %vm296_vm3, %v513_v4, 0 }
 0x6be   :  { %1549 = vmatpush3.bf16.msra.mxu1 %v518_v5  ;;  %v510_v6 = vpack.c.bf16 %v508_v3, %v508_v3 }
 0x6bf   :  { %1560 = vmatprep.subr.bf16.mxu1 %v1759_v15 }
 0x6c0   :  { %v609_v14 = vpop.permute.xlu0 %608 }
 0x6c1   :  { %1551 = vmatmul.mubr.msk.bf16.vlgmr.msra.gmra.mrb[8].mxu1 %vm171_vm2, %v510_v6 }
 0x6c2   :  { %1562 = vmatprep.mubr.msk.bf16.mxu1 %vm1760_vm1, %v1759_v15 }
 0x6c3   :  { %v1710_v8 = vpop.eup %1709 }
 0x6c4   :  { %v509_v9 = vmul.f32 %v1710_v8, %v1706_v60 }
 0x6c6   :  { %v511_v12 = vpack.c.bf16 %v509_v9, %v509_v9 }
 0x6c7   :  { %1561 = vmatpush3.bf16.xpose.msra.mxu1 %v616_v11 }
 0x6c8   :  { %1557 = vmatmul.mubr.msk.bf16.vlgmr.msra.gmra.mrb[20].mxu0 %vm171_vm2, %v511_v12  ;;  %1572 = vmatprep.subr.bf16.mxu1 %v1759_v15 }
 0x6c9   :  { %1567 = vmatpush3.bf16.xpose.msra.mxu0 %v666_v13  ;;  %1568 = vmatprep.mubr.msk.bf16.mxu0 %vm1760_vm1, %v1759_v15 }
 0x6ca   :  { %1578 = vmatprep.subr.bf16.mxu0 %v1759_v15 }
 0x6ce   :  { %1563 = vmatmul.mubr.msk.bf16.vlgmr.msra.gmra.mrb[12].mxu1 %vm171_vm2, %v609_v14 }
 0x6cf   :  { %1574 = vmatprep.mubr.msk.bf16.mxu1 %vm1760_vm1, %v1759_v15 }
 0x6d0   :  { %1569 = vmatmul.mubr.msk.bf16.vlgmr.msra.gmra.mrb[24].mxu0 %vm171_vm2, %v659_v16 }
 0x6d1   :  { %1580 = vmatprep.mubr.msk.bf16.mxu0 %vm1760_vm1, %v1759_v15 }
 0x794   :  { %v1987_v17 = vpop.f32.mrb[8].mxu1 }
 0x795   :  { %v1552_v18 = vpop.f32.mrb[9].mxu1 }
 0x796   :  { %v557_v19 = vpop.f32.mrb[10].mxu1 }
 0x797   :  { %v1553_v20 = vpop.f32.mrb[11].mxu1 }
 0x79b   :  { %v1989_v21 = vpop.f32.mrb[20].mxu0 }
 0x79c   :  { %v1662_v22 = vpack.i.bf16 %v1989_v21, %v1987_v17  ;;  %v1558_v23 = vpop.f32.mrb[21].mxu0 }
 0x79d   :  { %v605_v24 = vpop.f32.mrb[22].mxu0 }
 0x79e   :  { %v1559_v25 = vpop.f32.mrb[23].mxu0 }
 0x7a1   :  { %v652_v26 = vpop.f32.mrb[12].mxu1 }
 0x7a2   :  { %v653_v28 = vadd.f32 %v652_v26, %v1917_v47  ;;  %v1564_v29 = vpop.f32.mrb[13].mxu1 }
 0x7a3   :  { %v655_v30 = vpop.f32.mrb[14].mxu1  ;;  %v702_v32 = vpop.f32.mrb[24].mxu0 }
 0x7a4   :  { %v703_v33 = vadd.f32 %v702_v32, %v1917_v47  ;;  %v1565_v34 = vpop.f32.mrb[15].mxu1  ;;  %v1570_v35 = vpop.f32.mrb[25].mxu0  ;;  %v708_v36 = vsel %vm171_vm2, %v653_v28, -inf }
 0x7a5   :  { %709 = vmax.xlane.f32.xlu0 %v708_v36  ;;  %v705_v37 = vpop.f32.mrb[26].mxu0 }
 0x7a6   :  { %v1571_v38 = vpop.f32.mrb[27].mxu0  ;;  %v711_v40 = vsel %vm171_vm2, %v703_v33, -inf }
 0x7a7   :  { %712 = vmax.xlane.f32.xlu1 %v711_v40 }
 0x7b8   :  { %780 = vrot.lane.b32.xlu1 %v1898_v42, %s1768_s30 }
 0x7bc   :  { %830 = vrot.lane.b32.xlu1 %v1896_v39, %s1769_s15 }
 0x7c0   :  { %880 = vrot.lane.b32.xlu1 %v1898_v42, %s1769_s15 }
 0x7c4   :  { %878 = vrot.lane.b32.xlu1 %v1898_v42, %s1770_s16 }
 0x832   :  { %v710_v41 = vpop.xlane.xlu0 %709 }
 0x833   :  { %v714_v43 = vsub.f32 %v653_v28, %v710_v41 }
 0x834   :  { %v713_v44 = vpop.xlane.xlu1 %712 }
 0x835   :  { %v716_v45 = vmul.f32 1.442695, %v714_v43  ;;  %v715_v46 = vsub.f32 %v703_v33, %v713_v44 }
 0x837   :  { %1711 = vpow2.f32 %v716_v45  ;;  %v718_v48 = vmul.f32 1.442695, %v715_v46 }
 0x838   :  { %v781_v49 = vpop.permute.xlu1 %780 }
 0x839   :  { %1713 = vpow2.f32 %v718_v48  ;;  %v786_v50 = vsel %vm296_vm3, %v781_v49, 0 }
 0x83a   :  { %1579 = vmatpush3.bf16.msra.mxu0 %v786_v50 }
 0x83b   :  { %1590 = vmatprep.subr.bf16.mxu0 %v1759_v15 }
 0x83c   :  { %v831_v60 = vpop.permute.xlu1 %830 }
 0x83d   :  { %v836_v4 = vsel %vm171_vm2, %v831_v60, 0 }
 0x840   :  { %v881_v3 = vpop.permute.xlu1 %880 }
 0x841   :  { %v1712_v51 = vpop.eup %1711  ;;  %v886_v6 = vsel %vm171_vm2, %v881_v3, 0 }
 0x842   :  { %v720_v52 = vsel %vm171_vm2, %v1712_v51, 0.0 }
 0x843   :  { %v1714_v53 = vpop.eup %1713  ;;  %721 = vadd.xlane.f32.xlu0 %v720_v52 }
 0x844   :  { %v723_v54 = vsel %vm171_vm2, %v1714_v53, 0.0  ;;  %v879_v8 = vpop.permute.xlu1 %878 }
 0x847   :  { %724 = vadd.xlane.f32.xlu0 %v723_v54 }
 0x85d   :  { %732 = vrot.lane.b32.xlu0 %v1896_v39, %s1768_s30 }
 0x861   :  { %828 = vrot.lane.b32.xlu0 %v1896_v39, %s1770_s16 }
 0x8d0   :  { %v722_v55 = vpop.xlane.xlu0 %721 }
 0x8d1   :  { %1715 = vrcp.f32 %v722_v55  ;;  %v1679_v55 = vld [vmem:[%s2153_s6] sm:$0xff]  }
 0x8d4   :  { %v725_v56 = vpop.xlane.xlu0 %724 }
 0x8d5   :  { %1717 = vrcp.f32 %v725_v56  ;;  %v1680_v56 = vld [vmem:[%s2153_s6 + $0x8] sm:$0xff]  }
 0x8d8   :  { %v733_v57 = vpop.permute.xlu0 %732 }
 0x8d9   :  { %v738_v58 = vsel %vm296_vm3, %v733_v57, 0 }
 0x8da   :  { %1573 = vmatpush3.bf16.msra.mxu1 %v738_v58 }
 0x8db   :  { %v1716_v59 = vpop.eup %1715  ;;  %1584 = vmatprep.subr.bf16.mxu1 %v1759_v15 }
 0x8dc   :  { %v728_v61 = vmul.f32 %v1716_v59, %v1712_v51  ;;  %v829_v7 = vpop.permute.xlu0 %828 }
 0x8de   :  { %v730_v62 = vpack.c.bf16 %v728_v61, %v728_v61 }
 0x8df   :  { %v1718_v63 = vpop.eup %1717 }
 0x8e0   :  { %v729_v2 = vmul.f32 %v1718_v63, %v1714_v53  ;;  %1575 = vmatmul.mubr.msk.bf16.vlgmr.msra.gmra.mrb[16].mxu1 %vm171_vm2, %v730_v62 }
 0x8e1   :  { %1586 = vmatprep.mubr.msk.bf16.mxu1 %vm1760_vm1, %v1759_v15 }
 0x8e2   :  { %v731_v5 = vpack.c.bf16 %v729_v2, %v729_v2 }
 0x8e3   :  { %1585 = vmatpush3.bf16.xpose.msra.mxu1 %v836_v4 }
 0x8e4   :  { %1581 = vmatmul.mubr.msk.bf16.vlgmr.msra.gmra.mrb[28].mxu0 %vm171_vm2, %v731_v5  ;;  %1596 = vmatprep.subr.bf16.mxu1 %v1759_v15 }
 0x8e5   :  { %1591 = vmatpush3.bf16.xpose.msra.mxu0 %v886_v6  ;;  %1592 = vmatprep.mubr.msk.bf16.mxu0 %vm1760_vm1, %v1759_v15 }
 0x8e6   :  { %1602 = vmatprep.subr.bf16.mxu0 %v1759_v15 }
 0x8ea   :  { %1587 = vmatmul.mubr.msk.bf16.vlgmr.msra.gmra.mrb[20].mxu1 %vm171_vm2, %v829_v7 }
 0x8eb   :  { %1598 = vmatprep.mubr.msk.bf16.mxu1 %vm1760_vm1, %v1759_v15 }
 0x8ec   :  { %1593 = vmatmul.mubr.msk.bf16.vlgmr.msra.gmra.mrb[32].mxu0 %vm171_vm2, %v879_v8 }
 0x8ed   :  { %1604 = vmatprep.mubr.msk.bf16.mxu0 %vm1760_vm1, %v1759_v15 }
 0x9b3   :  { %v774_v9 = vpop.f32.mrb[16].mxu1 }
 0x9b4   :  { %v1576_v10 = vpop.f32.mrb[17].mxu1 }
 0x9b5   :  { %v777_v11 = vpop.f32.mrb[18].mxu1 }
 0x9b6   :  { %v1577_v12 = vpop.f32.mrb[19].mxu1 }
 0x9b7   :  { %v822_v13 = vpop.f32.mrb[28].mxu0 }
 0x9b8   :  { %v1667_v14 = vpack.i.bf16 %v822_v13, %v774_v9  ;;  %v1582_v16 = vpop.f32.mrb[29].mxu0 }
 0x9b9   :  { %v825_v18 = vpop.f32.mrb[30].mxu0 }
 0x9ba   :  { %v1583_v19 = vpop.f32.mrb[31].mxu0 }
 0x9bd   :  { %v872_v20 = vpop.f32.mrb[20].mxu1 }
 0x9be   :  { %v873_v23 = vadd.f32 %v872_v20, %v1917_v47  ;;  %v1588_v24 = vpop.f32.mrb[21].mxu1 }
 0x9bf   :  { %v875_v25 = vpop.f32.mrb[22].mxu1  ;;  %v922_v26 = vpop.f32.mrb[32].mxu0  ;;  %v1435_v24 = vld [vmem:[%s2154_s7] ss:$0 sm:$0xff]  ;;  %s1775_s7 = smov [#allocation2]  }
 0x9c0   :  { %v923_v28 = vadd.f32 %v922_v26, %v1917_v47  ;;  %v1589_v29 = vpop.f32.mrb[23].mxu1  ;;  %v1594_v30 = vpop.f32.mrb[33].mxu0  ;;  %v928_v32 = vsel %vm171_vm2, %v873_v23, -inf  ;;  %s1402_s24 = sshll.u32 %s1775_s7, 4  ;;  %s1403_s24 = int_to_ptr.vmem [resolvable:$true] %s1402_s24 }
 0x9c1   :  { %929 = vmax.xlane.f32.xlu0 %v928_v32  ;;  %v925_v33 = vpop.f32.mrb[34].mxu0  ;;  %s1735_s2 = scalar_lea.vmem %s1403_s24, 256  ;;  %p1740_p1 = scmp.lt.s32.totalorder %s1403_s24, %s1403_s24 }
 0x9c2   :  { %v1595_v34 = vpop.f32.mrb[35].mxu0  ;;  %v931_v35 = vsel %vm171_vm2, %v923_v28, -inf  ;;  %p1736_p0 = scmp.ne.s32.totalorder %s1403_s24, %s1735_s2  ;;  %p1741_p2 = scmp.lt.s32.totalorder %s1735_s2, %s1735_s2 }
 0x9c3   :  { %932 = vmax.xlane.f32.xlu1 %v931_v35 }
 0x9c4   :  { %p1742_p3 = por %p1741_p2, %p1740_p1 }
 0x9c6   :  { %p1743_p4 = pnand %p1742_p3, %p1736_p0 }
 0x9d4   :  { %1000 = vrot.lane.b32.xlu1 %v1898_v42, %s1771_s0 }
 0x9d8   :  { %1663 = vrot.lane.b32.xlu1 %v1662_v22, %s1772_s17 }
 0x9dc   :  { %1668 = vrot.lane.b32.xlu1 %v1667_v14, %s1773_s18 }
 0xa4e   :  { %v930_v47 = vpop.xlane.xlu0 %929 }
 0xa4f   :  { %v934_v36 = vsub.f32 %v873_v23, %v930_v47 }
 0xa50   :  { %v933_v37 = vpop.xlane.xlu1 %932 }
 0xa51   :  { %v936_v38 = vmul.f32 1.442695, %v934_v36  ;;  %v935_v40 = vsub.f32 %v923_v28, %v933_v37 }
 0xa53   :  { %1719 = vpow2.f32 %v936_v38  ;;  %v938_v41 = vmul.f32 1.442695, %v935_v40 }
 0xa54   :  { %v1001_v43 = vpop.permute.xlu1 %1000 }
 0xa55   :  { %1721 = vpow2.f32 %v938_v41  ;;  %v1006_v44 = vsel %vm296_vm3, %v1001_v43, 0 }
 0xa56   :  { %1603 = vmatpush3.bf16.msra.mxu0 %v1006_v44  ;;  %v1681_v44 = vld [vmem:[%s2157_s10] sm:$0xff]  }
 0xa57   :  { %1616 = vmatprep.subr.bf16.mxu0 %v1759_v15 }
 0xa58   :  { %v1664_v4 = vpop.permute.xlu1 %1663 }
 0xa59   :  { %v1666_v6 = vunpack.i.h.bf16 %v1664_v4  ;;  %v1665_v7 = vunpack.i.l.bf16 %v1664_v4  ;;  %v1690_v4 = vld [vmem:[%s2159_s12 + $0x38] sm:$0xff]  }
 0xa5b   :  { %v1073_v11 = vsel %vm171_vm2, %v1953_v31, %v1666_v6  ;;  %v1072_v12 = vsel %vm171_vm2, %v1951_v27, %v1665_v7 }
 0xa5c   :  { %v1669_v5 = vpop.permute.xlu1 %1668 }
 0xa5d   :  { %v1720_v42 = vpop.eup %1719  ;;  %v1671_v8 = vunpack.i.h.bf16 %v1669_v5  ;;  %v1670_v9 = vunpack.i.l.bf16 %v1669_v5  ;;  %v1441_v5 = vld [vmem:[%s2158_s11] ss:$0 sm:$0xff] }
 0xa5e   :  { %v940_v17 = vsel %vm171_vm2, %v1720_v42, 0.0 }
 0xa5f   :  { %v1722_v21 = vpop.eup %1721  ;;  %941 = vadd.xlane.f32.xlu0 %v940_v17  ;;  %v1075_v16 = vsel %vm1074_vm4, %v1072_v12, %v1670_v9  ;;  %v1076_v18 = vsel %vm1074_vm4, %v1073_v11, %v1671_v8 }
 0xa60   :  { %v943_v22 = vsel %vm171_vm2, %v1722_v21, 0.0 }
 0xa63   :  { %944 = vadd.xlane.f32.xlu0 %v943_v22 }
 0xa79   :  { %952 = vrot.lane.b32.xlu0 %v1896_v39, %s1771_s0 }
 0xaec   :  { %v942_v45 = vpop.xlane.xlu0 %941 }
 0xaed   :  { %1723 = vrcp.f32 %v942_v45 }
 0xaf0   :  { %v945_v46 = vpop.xlane.xlu0 %944 }
 0xaf1   :  { %1725 = vrcp.f32 %v945_v46 }
 0xaf4   :  { %v953_v48 = vpop.permute.xlu0 %952 }
 0xaf5   :  { %v958_v49 = vsel %vm296_vm3, %v953_v48, 0 }
 0xaf6   :  { %1597 = vmatpush3.bf16.msra.mxu1 %v958_v49 }
 0xaf7   :  { %v1724_v50 = vpop.eup %1723  ;;  %1608 = vmatprep.subr.bf16.mxu1 %v1759_v15 }
 0xaf8   :  { %v948_v51 = vmul.f32 %v1724_v50, %v1720_v42  ;;  %v1682_v42 = vld [vmem:[%s2157_s10 + $0x8] sm:$0xff]  }
 0xafa   :  { %v950_v52 = vpack.c.bf16 %v948_v51, %v948_v51  ;;  %v1439_v51 = vld [vmem:[%s2155_s8] ss:$0 sm:$0xff] }
 0xafb   :  { %v1726_v53 = vpop.eup %1725 }
 0xafc   :  { %v949_v54 = vmul.f32 %v1726_v53, %v1722_v21  ;;  %1599 = vmatmul.mubr.msk.bf16.vlgmr.msra.gmra.mrb[24].mxu1 %vm171_vm2, %v950_v52 }
 0xafd   :  { %1612 = vmatprep.mubr.msk.bf16.mxu1 %vm1760_vm1, %v1759_v15  ;;  %1609 = vmatpush3.bf16.msra.mxu1 %v1679_v55 }
 0xafe   :  { %v951_v39 = vpack.c.bf16 %v949_v54, %v949_v54  ;;  %1610 = vmatprep.subr.bf16.mxu1 %v1759_v15 }
 0xb00   :  { %1605 = vmatmul.mubr.msk.bf16.vlgmr.msra.gmra.mrb[36].mxu0 %vm171_vm2, %v951_v39  ;;  %v1440_v39 = vld [vmem:[%s2156_s9] ss:$0 sm:$0xff] }
 0xb01   :  { %1620 = vmatprep.mubr.msk.bf16.mxu0 %vm1760_vm1, %v1759_v15  ;;  %1611 = vmatpush3.bf16.msra.mxu1 %v1680_v56 }
 0xb02   :  { %1624 = vmatprep.subr.bf16.mxu1 %v1759_v15  ;;  %1617 = vmatpush3.bf16.msra.mxu0 %v1681_v44 }
 0xb03   :  { %1618 = vmatprep.subr.bf16.mxu0 %v1759_v15 }
 0xb06   :  { %1619 = vmatpush3.bf16.msra.mxu0 %v1682_v42 }
 0xbcf   :  { %v994_v57 = vpop.f32.mrb[24].mxu1 }
 0xbd0   :  { %v1600_v58 = vpop.f32.mrb[25].mxu1 }
 0xbd1   :  { %v997_v59 = vpop.f32.mrb[26].mxu1 }
 0xbd2   :  { %v1601_v60 = vpop.f32.mrb[27].mxu1  ;;  %v1683_v59 = vld [vmem:[%s2159_s12] sm:$0xff]  }
 0xbd3   :  { %v1042_v61 = vpop.f32.mrb[36].mxu0  ;;  %v1684_v60 = vld [vmem:[%s2159_s12 + $0x8] sm:$0xff]  }
 0xbd4   :  { %v1672_v62 = vpack.i.bf16 %v1042_v61, %v994_v57  ;;  %v1606_v63 = vpop.f32.mrb[37].mxu0  ;;  %v1685_v61 = vld [vmem:[%s2159_s12 + $0x10] sm:$0xff]  }
 0xbd5   :  { %v1045_v2 = vpop.f32.mrb[38].mxu0  ;;  %v1687_v63 = vld [vmem:[%s2159_s12 + $0x20] sm:$0xff]  }
 0xbd6   :  { %1673 = vrot.lane.b32.xlu0 %v1672_v62, %s1774_s22  ;;  %v1607_v3 = vpop.f32.mrb[39].mxu0  ;;  %v1686_v62 = vld [vmem:[%s2159_s12 + $0x18] sm:$0xff]   ;;  %v1688_v2 = vld [vmem:[%s2159_s12 + $0x28] sm:$0xff]  }
 0xbd7   :  { %v1689_v3 = vld [vmem:[%s2159_s12 + $0x30] sm:$0xff]  }
 0xc48   :  { %v1674_v10 = vpop.permute.xlu0 %1673 }
 0xc49   :  { %v1676_v13 = vunpack.i.h.bf16 %v1674_v10  ;;  %v1675_v14 = vunpack.i.l.bf16 %v1674_v10 }
 0xc4b   :  { %v1079_v19 = vsel %vm1077_vm5, %v1076_v18, %v1676_v13  ;;  %v1078_v20 = vsel %vm1077_vm5, %v1075_v16, %v1675_v14 }
 0xc4c   :  { %v1080_v23 = vpack.c.bf16 %v1079_v19, %v1078_v20 }
 0xc4e   :  { %1613 = vmatmul.mubr.msk.bf16.vlgmr.msra.gmra.mrb[28].mxu1 %vm53_vm0, %v1080_v23 }
 0xc4f   :  { %1640 = vmatprep.mubr.msk.bf16.mxu1 %vm1760_vm1, %v1759_v15  ;;  %1625 = vmatpush3.bf16.msra.mxu1 %v1683_v59 }
 0xc50   :  { %1626 = vmatprep.subr.bf16.mxu1 %v1759_v15 }
 0xc53   :  { %1627 = vmatpush3.bf16.msra.mxu1 %v1684_v60 }
 0xc54   :  { %1628 = vmatprep.subr.bf16.mxu1 %v1759_v15 }
 0xc57   :  { %1629 = vmatpush3.bf16.msra.mxu1 %v1685_v61 }
 0xc58   :  { %1630 = vmatprep.subr.bf16.mxu1 %v1759_v15 }
 0xc5b   :  { %1631 = vmatpush3.bf16.msra.mxu1 %v1686_v62 }
 0xc5c   :  { %1632 = vmatprep.subr.bf16.mxu1 %v1759_v15 }
 0xc5f   :  { %1633 = vmatpush3.bf16.msra.mxu1 %v1687_v63 }
 0xc60   :  { %1634 = vmatprep.subr.bf16.mxu1 %v1759_v15 }
 0xc63   :  { %1635 = vmatpush3.bf16.msra.mxu1 %v1688_v2 }
 0xc64   :  { %1636 = vmatprep.subr.bf16.mxu1 %v1759_v15 }
 0xc67   :  { %1637 = vmatpush3.bf16.msra.mxu1 %v1689_v3 }
 0xc68   :  { %1638 = vmatprep.subr.bf16.mxu1 %v1759_v15 }
 0xc6b   :  { %1639 = vmatpush3.bf16.msra.mxu1 %v1690_v4 }
 0xd21   :  { %v1141_v31 = vpop.f32.mrb[28].mxu1 }
 0xd22   :  { %v1142_v25 = vadd.f32 %v1435_v24, %v1141_v31  ;;  %v1614_v26 = vpop.f32.mrb[29].mxu1 }
 0xd23   :  { %v1144_v27 = vpop.f32.mrb[30].mxu1 }
 0xd24   :  { %v2066_v28 = vadd.f32 %v1142_v25, %v1855_v0  ;;  %v1145_v29 = vadd.f32 %v1435_v24, %v1144_v27  ;;  %v1615_v30 = vpop.f32.mrb[31].mxu1 }
 0xd26   :  { %v2069_v32 = vadd.f32 %v1145_v29, %v1860_v1  ;;  %v1152_v33 = vsel %vm53_vm0, %v2066_v28, 0.0 }
 0xd27   :  { %1153 = vadd.xlane.f32.xlu1 %v1152_v33 }
 0xd28   :  { %v1155_v34 = vsel %vm53_vm0, %v2069_v32, 0.0 }
 0xd29   :  { %1156 = vadd.xlane.f32.xlu0 %v1155_v34 }
 0xdb4   :  { %v1154_v35 = vpop.xlane.xlu1 %1153 }
 0xdb5   :  { %v1158_v47 = vmul.f32 0.03125, %v1154_v35 }
 0xdb6   :  { %v1157_v36 = vpop.xlane.xlu0 %1156 }
 0xdb7   :  { %v1160_v37 = vsub.f32 %v2066_v28, %v1158_v47  ;;  %v1159_v0 = vmul.f32 0.03125, %v1157_v36  ;;  %v1445_v47 = vld [vmem:[%s2160_s13] ss:$0 sm:$0xff] }
 0xdb9   :  { %v1161_v38 = vsub.f32 %v2069_v32, %v1159_v0  ;;  %v1162_v40 = vmul.f32 %v1160_v37, %v1160_v37 }
 0xdbb   :  { %v1164_v1 = vsel %vm53_vm0, %v1162_v40, 0.0  ;;  %v1163_v41 = vmul.f32 %v1161_v38, %v1161_v38 }
 0xdbc   :  { %1165 = vadd.xlane.f32.xlu0 %v1164_v1 }
 0xdbd   :  { %v1167_v43 = vsel %vm53_vm0, %v1163_v41, 0.0 }
 0xdc0   :  { %1168 = vadd.xlane.f32.xlu0 %v1167_v43 }
 0xe49   :  { %v1166_v17 = vpop.xlane.xlu0 %1165 }
 0xe4a   :  { %v1170_v21 = vmul.f32 0.03125, %v1166_v17 }
 0xe4c   :  { %v1172_v22 = vadd.f32 1e-05, %v1170_v21 }
 0xe4d   :  { %v1169_v45 = vpop.xlane.xlu0 %1168 }
 0xe4e   :  { %1727 = vrsqrt.f32 %v1172_v22  ;;  %v1171_v46 = vmul.f32 0.03125, %v1169_v45 }
 0xe50   :  { %v1173_v48 = vadd.f32 1e-05, %v1171_v46 }
 0xe52   :  { %1729 = vrsqrt.f32 %v1173_v48 }
 0xe58   :  { %v1728_v49 = vpop.eup %1727 }
 0xe59   :  { %v1176_v50 = vmul.f32 %v1728_v49, %v1160_v37 }
 0xe5b   :  { %v1184_v53 = vmul.f32 %v1439_v51, %v1176_v50 }
 0xe5c   :  { %v1730_v52 = vpop.eup %1729 }
 0xe5d   :  { %v1177_v54 = vmul.f32 %v1730_v52, %v1161_v38  ;;  %v1192_v56 = vadd.f32 %v1440_v39, %v1184_v53 }
 0xe5f   :  { %v1185_v55 = vmul.f32 %v1439_v51, %v1177_v54 }
 0xe61   :  { %v1193_v57 = vadd.f32 %v1440_v39, %v1185_v55 }
 0xe63   :  { %v1194_v58 = vpack.c.bf16 %v1193_v57, %v1192_v56 }
 0xe65   :  { %1621 = vmatmul.mubr.msk.bf16.vlgmr.msra.gmra.mrb[40].mxu0 %vm53_vm0, %v1194_v58 }
 0xf38   :  { %v1255_v6 = vpop.f32.mrb[40].mxu0 }
 0xf39   :  { %v1256_v7 = vadd.f32 %v1441_v5, %v1255_v6  ;;  %v1622_v8 = vpop.f32.mrb[41].mxu0 }
 0xf3a   :  { %v1258_v9 = vpop.f32.mrb[42].mxu0 }
 0xf3b   :  { %v1262_v10 = vmul.f32 %v1256_v7, %v1256_v7  ;;  %v1259_v11 = vadd.f32 %v1441_v5, %v1258_v9  ;;  %v1623_v12 = vpop.f32.mrb[43].mxu0 }
 0xf3d   :  { %v1264_v13 = vmul.f32 %v1262_v10, %v1256_v7  ;;  %v1263_v14 = vmul.f32 %v1259_v11, %v1259_v11 }
 0xf3f   :  { %v1266_v16 = vmul.f32 0.044715, %v1264_v13  ;;  %v1265_v15 = vmul.f32 %v1263_v14, %v1259_v11 }
 0xf41   :  { %v1268_v18 = vadd.f32 %v1266_v16, %v1256_v7  ;;  %v1267_v19 = vmul.f32 0.044715, %v1265_v15 }
 0xf43   :  { %v1270_v20 = vmul.f32 0.7978846, %v1268_v18  ;;  %v1269_v23 = vadd.f32 %v1267_v19, %v1259_v11 }
 0xf45   :  { %1731 = vtanh.f32 %v1270_v20  ;;  %v1271_v24 = vmul.f32 0.7978846, %v1269_v23 }
 0xf47   :  { %1733 = vtanh.f32 %v1271_v24 }
 0xf4f   :  { %v1732_v31 = vpop.eup %1731 }
 0xf50   :  { %v1274_v25 = vadd.f32 1.0, %v1732_v31 }
 0xf51   :  { %v1734_v26 = vpop.eup %1733 }
 0xf52   :  { %v1276_v27 = vmul.f32 0.5, %v1274_v25  ;;  %v1275_v29 = vadd.f32 1.0, %v1734_v26 }
 0xf54   :  { %v1277_v30 = vmul.f32 0.5, %v1275_v29  ;;  %v1278_v33 = vmul.f32 %v1276_v27, %v1256_v7 }
 0xf56   :  { %v1279_v34 = vmul.f32 %v1277_v30, %v1259_v11 }
 0xf58   :  { %v1280_v35 = vpack.c.bf16 %v1279_v34, %v1278_v33 }
 0xf5a   :  { %1641 = vmatmul.mubr.bf16.vlgmr.msra.gmra.mrb[32].mxu1 %v1280_v35 }
0x102d   :  { %v1386_v36 = vpop.f32.mrb[32].mxu1 }
0x102e   :  { %v1387_v37 = vadd.f32 %v1445_v47, %v1386_v36  ;;  %v1642_v0 = vpop.f32.mrb[33].mxu1 }
0x102f   :  { %v1389_v38 = vpop.f32.mrb[34].mxu1 }
0x1030   :  { %v1393_v40 = vadd.f32 %v1387_v37, %v2066_v28  ;;  %v1390_v1 = vadd.f32 %v1445_v47, %v1389_v38  ;;  %v1643_v41 = vpop.f32.mrb[35].mxu1 }
0x1032   :  { %1395 = vst.msk [vmem:[#allocation2] sm:$0xff] %vm53_vm0, %v1393_v40  ;;  %v1394_v43 = vadd.f32 %v1390_v1, %v2069_v32 }
0x1034   :  { %1396 = vst.msk [vmem:[#allocation2 + $0x8] sm:$0xff] %vm53_vm0, %v1394_v43 }
0x1035   :  { %1746 = shalt.err (!%p1743_p4)
}
0x1036   :  { %s1747_s5 = scalar_lea.hbm %s2161_s14, 256 }
0x1037   :  { %p1748_p5 = scmp.ne.s32.totalorder %s2161_s14, %s1747_s5  ;;  %p1751_p6 = scmp.lt.u32.totalorder %s1747_s5, %s2161_s14 }
0x1039   :  { %p1753_p7 = pnand %p1751_p6, %p1748_p5 }
0x103b   :  { %1756 = shalt.err (!%p1753_p7)
}
0x103c   :  { %s1776_s27 = smov 128  }
0x103d   :  { %1408 = dma.vmem_to_hbm [thread:$0]  %s1403_s24, 256, %s2161_s14, [#allocation3], %s1776_s27, %s1776_s27, %s1772_s17  }
0x103e   :  { %1757 = dma.done.wait [#allocation3], 256  }
0x103f   :  { %1758 = vsyncadd [#allocation3], 4294967040 }
0x1040   :  { %1412 = vsyncpa [#allocation3], 1 }

</bundles_post_ra>
